<compile_context>
chip_gen: v5e
topology: v5e:2x2
jax: 0.10.0
libtpu: 0.0.40
codegen_flags: <defaults>
</compile_context>

<pallas_src>
import functools

import jax
import jax.numpy as jnp
from jax.experimental import pallas as pl
from jax.experimental.pallas import tpu as pltpu


# ----------------------------- Kernel 1: layer 1 -----------------------------

def _layer1_kernel(x_ref, w1_ref, b1_ref, h1_ref, acc_ref):
    """Grid = (num_n_tiles, num_k_tiles); k (reduction over num_input) innermost.

    x_ref  : (num_k_tiles, B, tk) bf16, VMEM-resident (constant index_map)
    w1_ref : (tk, tn)             bf16, streamed per grid step
    b1_ref : (1, tn)              f32
    h1_ref : (B, tn)              bf16 output tile
    acc_ref: (B, tn)              f32 VMEM accumulator
    """
    k = pl.program_id(1)

    @pl.when(k == 0)
    def _init_acc():
        acc_ref[...] = jnp.zeros_like(acc_ref)

    acc_ref[...] += jnp.dot(x_ref[k], w1_ref[...],
                            preferred_element_type=jnp.float32)

    @pl.when(k == pl.num_programs(1) - 1)
    def _finish_n_tile():
        # bias + ReLU in f32, store as bf16 for the next MXU op.
        h1_ref[...] = jnp.maximum(acc_ref[...] + b1_ref[...], 0.0).astype(h1_ref.dtype)
        # TODO(synk): training-mode dropout would go here via
        # pltpu.prng_seed + pltpu.stateful_bernoulli; identity in eval mode.


# ------------------------ Kernel 2: layers 2/3 + tail ------------------------

def _tail_kernel(h1_ref, w2_ref, b2_ref, w3_ref, b3_ref, o_ref, h2_ref):
    """Single invocation: relu(h1@W2+b2) -> (.)@W3+b3 -> log_softmax."""
    h2 = jnp.dot(h1_ref[...], w2_ref[...], preferred_element_type=jnp.float32)
    h2 = jnp.maximum(h2 + b2_ref[...], 0.0)
    # Stage h2 in VMEM as bf16: bounds register pressure at large batch and
    # feeds the next MXU op in bf16.
    h2_ref[...] = h2.astype(h2_ref.dtype)
    # TODO(synk): training-mode dropout on h2 (identity in eval mode).

    logits = jnp.dot(h2_ref[...], w3_ref[...],
                     preferred_element_type=jnp.float32) + b3_ref[...]

    # log_softmax along dim=1 (numerically stable), f32.
    # (optional polish skipped: padding num_output to 128 lanes — tail runs once.)
    m = jnp.max(logits, axis=1, keepdims=True)
    shifted = logits - m
    lse = jnp.log(jnp.sum(jnp.exp(shifted), axis=1, keepdims=True))
    o_ref[...] = shifted - lse


# --------------------------------- Wrapper -----------------------------------

def _pick_tile(dim, target):
    """Largest tile <= target that divides `dim` and is a multiple of 128
    (or the full dim if it already fits / has no nice divisor).  Production
    dims (25088, 4096) divide cleanly by the defaults (3584, 1024)."""
    if dim <= target:
        return dim
    t = (min(target, dim) // 128) * 128
    while t >= 128:
        if dim % t == 0:
            return t
        t -= 128
    return dim


def prepare_params(params):
    """One-time prep outside the hot path: bf16 weights (MXU inputs), f32 (1,D)
    biases.  Never cast f32 weights per call — that triples HBM traffic."""
    prepared = []
    for w, b in params:
        prepared.append((jnp.asarray(w, jnp.bfloat16),
                         jnp.asarray(b, jnp.float32).reshape(1, -1)))
    return prepared


def classifier_arm_forward(x, params, *, tk_target=3584, tn_target=1024):
    """x: [B, C, H, W] (NCHW, like PyTorch). params: output of prepare_params.
    Returns [B, num_output] f32 log-probs.

    Default tile targets are sized for the real model (25088 -> 4096): a 7 MiB
    bf16 W1 tile, ~14 MiB double-buffered, plus a resident x block stays well
    under the explicit 48 MiB VMEM limit (safe on v5e/v6e/v7x; raise further on
    v5e/v6e, which have 128 MiB physical VMEM, for marginal extra gains).
    """
    (w1, b1), (w2, b2), (w3, b3) = params
    B = x.shape[0]
    K, N1 = w1.shape
    N2 = w2.shape[1]
    num_out = w3.shape[1]

    tk = _pick_tile(K, tk_target)
    tn = _pick_tile(N1, tn_target)
    nk = K // tk
    nn = N1 // tn
    assert nk * tk == K and nn * tn == N1

    # Flatten (torch .view(B, -1)), cast x to bf16 once, and lay it out as
    # (nk, B, tk) so the kernel indexes k-tiles along the leading axis.  Under
    # jit this fuses with the (unavoidable) activation cast.
    xt = x.reshape(B, -1).astype(jnp.bfloat16).reshape(B, nk, tk).transpose(1, 0, 2)

    vmem_limit = 48 * 1024 * 1024

    # ---------------- Kernel 1: streamed layer-1 matmul ----------------
    l1_cost = pl.CostEstimate(
        flops=2 * B * K * N1,
        transcendentals=0,
        bytes_accessed=B * K * 2 + K * N1 * 2 + N1 * 4 + B * N1 * 2,
    )
    h1 = pl.pallas_call(
        _layer1_kernel,
        out_shape=jax.ShapeDtypeStruct((B, N1), jnp.bfloat16),
        grid_spec=pltpu.PrefetchScalarGridSpec(
            num_scalar_prefetch=0,
            grid=(nn, nk),                                   # reduction (k) innermost
            in_specs=[
                pl.BlockSpec((nk, B, tk), lambda n, k: (0, 0, 0)),  # x: one DMA, resident
                pl.BlockSpec((tk, tn), lambda n, k: (k, n)),        # W1: streamed tiles
                pl.BlockSpec((1, tn), lambda n, k: (0, n)),         # b1: per N tile
            ],
            out_specs=pl.BlockSpec((B, tn), lambda n, k: (0, n)),
            scratch_shapes=[pltpu.VMEM((B, tn), jnp.float32)],      # f32 accumulator
        ),
        compiler_params=pltpu.CompilerParams(
            # Tail split out -> the N1 axis is truly parallel (megacore on v7x).
            dimension_semantics=("parallel", "arbitrary"),
            vmem_limit_bytes=vmem_limit,
        ),
        cost_estimate=l1_cost,
    )(xt, w1, b1)

    # -------------- Kernel 2: layers 2/3 + log_softmax (tiny) --------------
    tail_cost = pl.CostEstimate(
        flops=2 * B * (N1 * N2 + N2 * num_out),
        transcendentals=B * (num_out + 1),
        bytes_accessed=(B * N1 * 2 + N1 * N2 * 2 + N2 * 4
                        + N2 * num_out * 2 + num_out * 4 + B * num_out * 4),
    )
    out = pl.pallas_call(
        _tail_kernel,
        out_shape=jax.ShapeDtypeStruct((B, num_out), jnp.float32),
        grid_spec=pltpu.PrefetchScalarGridSpec(
            num_scalar_prefetch=0,
            grid=(1,),
            in_specs=[
                pl.BlockSpec((B, N1), lambda i: (0, 0)),
                pl.BlockSpec((N1, N2), lambda i: (0, 0)),
                pl.BlockSpec((1, N2), lambda i: (0, 0)),
                pl.BlockSpec((N2, num_out), lambda i: (0, 0)),
                pl.BlockSpec((1, num_out), lambda i: (0, 0)),
            ],
            out_specs=pl.BlockSpec((B, num_out), lambda i: (0, 0)),
            scratch_shapes=[pltpu.VMEM((B, N2), jnp.bfloat16)],     # h2 staging
        ),
        compiler_params=pltpu.CompilerParams(
            dimension_semantics=("arbitrary",),
            vmem_limit_bytes=vmem_limit,
        ),
        cost_estimate=tail_cost,
    )(h1, w2, b2, w3, b3)

    return out


# ------------------------------ Reference & init -----------------------------

def _reference_forward(x, params_f32):
    """Pure-JAX reference with the same bf16-input / f32-accumulate recipe."""
    (w1, b1), (w2, b2), (w3, b3) = params_f32
    B = x.shape[0]
    h = x.reshape(B, -1).astype(jnp.bfloat16)
    h = jnp.maximum(jnp.dot(h, w1.astype(jnp.bfloat16),
                            preferred_element_type=jnp.float32) + b1, 0.0)
    h = h.astype(jnp.bfloat16)
    h = jnp.maximum(jnp.dot(h, w2.astype(jnp.bfloat16),
                            preferred_element_type=jnp.float32) + b2, 0.0)
    logits = jnp.dot(h.astype(jnp.bfloat16), w3.astype(jnp.bfloat16),
                     preferred_element_type=jnp.float32) + b3
    return jax.nn.log_softmax(logits, axis=1)


def init_params(key, num_input, num_hidden, num_output):
    """Deterministic synthetic init. Weights stored [D_in, D_out], biases [1, D_out]."""
    dims = [num_input] + list(num_hidden) + [num_output]
    params = []
    for din, dout in zip(dims[:-1], dims[1:]):
        kw, kb, key = jax.random.split(key, 3)
        bound = 1.0 / jnp.sqrt(din)              # PyTorch nn.Linear default range
        w = jax.random.uniform(kw, (din, dout), jnp.float32, -bound, bound)
        b = jax.random.uniform(kb, (1, dout), jnp.float32, -bound, bound)
        params.append((w, b))
    return params


if __name__ == "__main__":
    # Small shapes consistent with the module's forward (x is NCHW, flattened
    # to num_input = C*H*W).  Stand-ins for 25088 -> [4096, 1024] -> 102.
    B, C, H, W = 2, 4, 16, 16
    num_input = C * H * W            # 1024
    num_hidden = [256, 128]
    num_output = 16

    key = jax.random.PRNGKey(0)
    kx, kp = jax.random.split(key)
    x = jax.random.normal(kx, (B, C, H, W), jnp.float32)
    params_f32 = init_params(kp, num_input, num_hidden, num_output)
    params = prepare_params(params_f32)          # one-time bf16 cast, outside hot path

    # Small tile targets so the toy run exercises a real (2 x 2) layer-1 grid:
    # K=1024 split into 2 x 512, N1=256 split into 2 x 128.
    fwd = jax.jit(functools.partial(classifier_arm_forward,
                                    tk_target=512, tn_target=128))
    out = jax.block_until_ready(fwd(x, params))

    ref = _reference_forward(x, params_f32)

    assert out.shape == (B, num_output)
    # log_softmax rows must sum (in prob space) to ~1
    row_sums = jnp.exp(out).sum(axis=1)
    assert bool(jnp.all(jnp.abs(row_sums - 1.0) < 1e-4))
    # match the pure-JAX reference (same bf16/f32 recipe; tolerance covers
    # accumulation-order differences between tiled and untiled sums)
    assert bool(jnp.allclose(out, ref, atol=2e-2, rtol=2e-2))
    print("KERNEL_OK")
</pallas_src>

<mosaic_0001>
module attributes {stable_mosaic.version = 11 : i64} {
  func.func @_layer1_kernel(%arg0: i32, %arg1: i32, %arg2: memref<2x2x512xbf16, #tpu.memory_space<vmem>>, %arg3: memref<512x128xbf16, #tpu.memory_space<vmem>>, %arg4: memref<1x128xf32, #tpu.memory_space<vmem>>, %arg5: memref<2x128xbf16, #tpu.memory_space<vmem>>, %arg6: memref<2x128xf32, #tpu.memory_space<vmem>>) attributes {dimension_semantics = [#tpu.dimension_semantics<parallel>, #tpu.dimension_semantics<arbitrary>], iteration_bounds = array<i64: 2, 2>, scalar_prefetch = 0 : i64, scratch_operands = 1 : i64, tpu.core_type = #tpu.core_type<tc>, window_params = [{pipeline_mode = #tpu.pipeline_mode<synchronous>, transform_indices = @transform_0, window_bounds = array<i64: 2, 2, 512>}, {transform_indices = @transform_1, window_bounds = array<i64: 512, 128>}, {transform_indices = @transform_2, window_bounds = array<i64: 1, 128>}, {transform_indices = @transform_3, window_bounds = array<i64: 2, 128>}]} {
    %c0_i32 = arith.constant 0 : i32
    %0 = arith.cmpi eq, %arg1, %c0_i32 : i32
    %1 = arith.extui %0 : i1 to i32
    %c0_i32_0 = arith.constant 0 : i32
    %2 = arith.cmpi ne, %1, %c0_i32_0 : i32
    scf.if %2 {
      %cst_9 = arith.constant 0.000000e+00 : f32
      %14 = vector.broadcast %cst_9 : f32 to vector<2x128xf32>
      %c0_10 = arith.constant 0 : index
      %c0_11 = arith.constant 0 : index
      %15 = vector.load %arg6[%c0_10, %c0_11] : memref<2x128xf32, #tpu.memory_space<vmem>>, vector<2x128xf32>
      tpu.vector_store %arg6[%c0_10, %c0_11], %14 {strides = array<i32>} : memref<2x128xf32, #tpu.memory_space<vmem>>, vector<2x128xf32>,
    } else {
    }
    %c0 = arith.constant 0 : index
    %c0_1 = arith.constant 0 : index
    %3 = vector.load %arg6[%c0, %c0_1] : memref<2x128xf32, #tpu.memory_space<vmem>>, vector<2x128xf32>
    %4 = arith.index_cast %arg1 : i32 to index
    %c0_2 = arith.constant 0 : index
    %c0_3 = arith.constant 0 : index
    %5 = vector.load %arg2[%4, %c0_2, %c0_3] : memref<2x2x512xbf16, #tpu.memory_space<vmem>>, vector<1x2x512xbf16>
    %6 = vector.shape_cast %5 : vector<1x2x512xbf16> to vector<2x512xbf16>
    %c0_4 = arith.constant 0 : index
    %c0_5 = arith.constant 0 : index
    %7 = vector.load %arg3[%c0_4, %c0_5] : memref<512x128xbf16, #tpu.memory_space<vmem>>, vector<512x128xbf16>
    %cst = arith.constant dense<0.000000e+00> : vector<2x128xf32>
    %8 = tpu.matmul %6, %7, %cst {dimension_numbers = #tpu.dot_dimension_numbers<[1], [0], [0], [1], [0, 0, 1, 1], [], []>} : vector<2x512xbf16>, vector<512x128xbf16>, vector<2x128xf32> -> vector<2x128xf32>
    %9 = arith.addf %3, %8 : vector<2x128xf32>
    %c0_6 = arith.constant 0 : index
    %c0_7 = arith.constant 0 : index
    %10 = vector.load %arg6[%c0_6, %c0_7] : memref<2x128xf32, #tpu.memory_space<vmem>>, vector<2x128xf32>
    tpu.vector_store %arg6[%c0_6, %c0_7], %9 {strides = array<i32>} : memref<2x128xf32, #tpu.memory_space<vmem>>, vector<2x128xf32>,
    %c1_i32 = arith.constant 1 : i32
    %11 = arith.cmpi eq, %arg1, %c1_i32 : i32
    %12 = arith.extui %11 : i1 to i32
    %c0_i32_8 = arith.constant 0 : i32
    %13 = arith.cmpi ne, %12, %c0_i32_8 : i32
    scf.if %13 {
      %c0_9 = arith.constant 0 : index
      %c0_10 = arith.constant 0 : index
      %14 = vector.load %arg6[%c0_9, %c0_10] : memref<2x128xf32, #tpu.memory_space<vmem>>, vector<2x128xf32>
      %c0_11 = arith.constant 0 : index
      %c0_12 = arith.constant 0 : index
      %15 = vector.load %arg4[%c0_11, %c0_12] : memref<1x128xf32, #tpu.memory_space<vmem>>, vector<1x128xf32>
      %16 = vector.broadcast %15 : vector<1x128xf32> to vector<2x128xf32>
      %17 = arith.addf %14, %16 : vector<2x128xf32>
      %cst_13 = arith.constant 0.000000e+00 : f32
      %18 = vector.broadcast %cst_13 : f32 to vector<2x128xf32>
      %19 = arith.maximumf %17, %18 : vector<2x128xf32>
      %20 = arith.truncf %19 : vector<2x128xf32> to vector<2x128xbf16>
      %c0_14 = arith.constant 0 : index
      %c0_15 = arith.constant 0 : index
      %21 = vector.load %arg5[%c0_14, %c0_15] : memref<2x128xbf16, #tpu.memory_space<vmem>>, vector<2x128xbf16>
      tpu.vector_store %arg5[%c0_14, %c0_15], %20 {strides = array<i32>} : memref<2x128xbf16, #tpu.memory_space<vmem>>, vector<2x128xbf16>,
    } else {
    }
    return
  }
  func.func @transform_0(%arg0: i32, %arg1: i32) -> (i32, i32, i32) {
    %c0_i32 = arith.constant 0 : i32
    %c0_i32_0 = arith.constant 0 : i32
    %c0_i32_1 = arith.constant 0 : i32
    %c0_i32_2 = arith.constant 0 : i32
    return %c0_i32, %c0_i32_0, %c0_i32_1 : i32, i32, i32
  }
  func.func @transform_1(%arg0: i32, %arg1: i32) -> (i32, i32) {
    %c0_i32 = arith.constant 0 : i32
    return %arg1, %arg0 : i32, i32
  }
  func.func @transform_2(%arg0: i32, %arg1: i32) -> (i32, i32) {
    %c0_i32 = arith.constant 0 : i32
    %c0_i32_0 = arith.constant 0 : i32
    return %c0_i32, %arg0 : i32, i32
  }
  func.func @transform_3(%arg0: i32, %arg1: i32) -> (i32, i32) {
    %c0_i32 = arith.constant 0 : i32
    %c0_i32_0 = arith.constant 0 : i32
    return %c0_i32, %arg0 : i32, i32
  }
}

module attributes {stable_mosaic.version = 11 : i64} {
  func.func @_tail_kernel(%arg0: i32, %arg1: memref<2x256xbf16, #tpu.memory_space<vmem>>, %arg2: memref<256x128xbf16, #tpu.memory_space<vmem>>, %arg3: memref<1x128xf32, #tpu.memory_space<vmem>>, %arg4: memref<128x16xbf16, #tpu.memory_space<vmem>>, %arg5: memref<1x16xf32, #tpu.memory_space<vmem>>, %arg6: memref<2x16xf32, #tpu.memory_space<vmem>>, %arg7: memref<2x128xbf16, #tpu.memory_space<vmem>>) attributes {dimension_semantics = [#tpu.dimension_semantics<arbitrary>], iteration_bounds = array<i64: 1>, scalar_prefetch = 0 : i64, scratch_operands = 1 : i64, tpu.core_type = #tpu.core_type<tc>, window_params = [{pipeline_mode = #tpu.pipeline_mode<synchronous>, transform_indices = @transform_0, window_bounds = array<i64: 2, 256>}, {pipeline_mode = #tpu.pipeline_mode<synchronous>, transform_indices = @transform_1, window_bounds = array<i64: 256, 128>}, {pipeline_mode = #tpu.pipeline_mode<synchronous>, transform_indices = @transform_2, window_bounds = array<i64: 1, 128>}, {pipeline_mode = #tpu.pipeline_mode<synchronous>, transform_indices = @transform_3, window_bounds = array<i64: 128, 16>}, {pipeline_mode = #tpu.pipeline_mode<synchronous>, transform_indices = @transform_4, window_bounds = array<i64: 1, 16>}, {pipeline_mode = #tpu.pipeline_mode<synchronous>, transform_indices = @transform_5, window_bounds = array<i64: 2, 16>}]} {
    %c0 = arith.constant 0 : index
    %c0_0 = arith.constant 0 : index
    %0 = vector.load %arg1[%c0, %c0_0] : memref<2x256xbf16, #tpu.memory_space<vmem>>, vector<2x256xbf16>
    %c0_1 = arith.constant 0 : index
    %c0_2 = arith.constant 0 : index
    %1 = vector.load %arg2[%c0_1, %c0_2] : memref<256x128xbf16, #tpu.memory_space<vmem>>, vector<256x128xbf16>
    %cst = arith.constant dense<0.000000e+00> : vector<2x128xf32>
    %2 = tpu.matmul %0, %1, %cst {dimension_numbers = #tpu.dot_dimension_numbers<[1], [0], [0], [1], [0, 0, 1, 1], [], []>} : vector<2x256xbf16>, vector<256x128xbf16>, vector<2x128xf32> -> vector<2x128xf32>
    %c0_3 = arith.constant 0 : index
    %c0_4 = arith.constant 0 : index
    %3 = vector.load %arg3[%c0_3, %c0_4] : memref<1x128xf32, #tpu.memory_space<vmem>>, vector<1x128xf32>
    %4 = vector.broadcast %3 : vector<1x128xf32> to vector<2x128xf32>
    %5 = arith.addf %2, %4 : vector<2x128xf32>
    %cst_5 = arith.constant 0.000000e+00 : f32
    %6 = vector.broadcast %cst_5 : f32 to vector<2x128xf32>
    %7 = arith.maximumf %5, %6 : vector<2x128xf32>
    %8 = arith.truncf %7 : vector<2x128xf32> to vector<2x128xbf16>
    %c0_6 = arith.constant 0 : index
    %c0_7 = arith.constant 0 : index
    %9 = vector.load %arg7[%c0_6, %c0_7] : memref<2x128xbf16, #tpu.memory_space<vmem>>, vector<2x128xbf16>
    tpu.vector_store %arg7[%c0_6, %c0_7], %8 {strides = array<i32>} : memref<2x128xbf16, #tpu.memory_space<vmem>>, vector<2x128xbf16>,
    %c0_8 = arith.constant 0 : index
    %c0_9 = arith.constant 0 : index
    %10 = vector.load %arg7[%c0_8, %c0_9] : memref<2x128xbf16, #tpu.memory_space<vmem>>, vector<2x128xbf16>
    %c0_10 = arith.constant 0 : index
    %c0_11 = arith.constant 0 : index
    %11 = vector.load %arg4[%c0_10, %c0_11] : memref<128x16xbf16, #tpu.memory_space<vmem>>, vector<128x16xbf16>
    %cst_12 = arith.constant dense<0.000000e+00> : vector<2x16xf32>
    %12 = tpu.matmul %10, %11, %cst_12 {dimension_numbers = #tpu.dot_dimension_numbers<[1], [0], [0], [1], [0, 0, 1, 1], [], []>} : vector<2x128xbf16>, vector<128x16xbf16>, vector<2x16xf32> -> vector<2x16xf32>
    %c0_13 = arith.constant 0 : index
    %c0_14 = arith.constant 0 : index
    %13 = vector.load %arg5[%c0_13, %c0_14] : memref<1x16xf32, #tpu.memory_space<vmem>>, vector<1x16xf32>
    %14 = vector.broadcast %13 : vector<1x16xf32> to vector<2x16xf32>
    %15 = arith.addf %12, %14 : vector<2x16xf32>
    %cst_15 = arith.constant dense<0xFF800000> : vector<2xf32>
    %16 = vector.multi_reduction <maximumf>, %15, %cst_15 [1] : vector<2x16xf32> to vector<2xf32>
    %17 = vector.shape_cast %16 : vector<2xf32> to vector<2x1xf32>
    %18 = vector.broadcast %17 : vector<2x1xf32> to vector<2x16xf32>
    %19 = arith.subf %15, %18 : vector<2x16xf32>
    %20 = math.exp %19 : vector<2x16xf32>
    %cst_16 = arith.constant dense<0.000000e+00> : vector<2xf32>
    %21 = vector.multi_reduction <add>, %20, %cst_16 [1] : vector<2x16xf32> to vector<2xf32>
    %22 = vector.shape_cast %21 : vector<2xf32> to vector<2x1xf32>
    %23 = math.log %22 : vector<2x1xf32>
    %24 = vector.broadcast %23 : vector<2x1xf32> to vector<2x16xf32>
    %25 = arith.subf %19, %24 : vector<2x16xf32>
    %c0_17 = arith.constant 0 : index
    %c0_18 = arith.constant 0 : index
    %26 = vector.load %arg6[%c0_17, %c0_18] : memref<2x16xf32, #tpu.memory_space<vmem>>, vector<2x16xf32>
    tpu.vector_store %arg6[%c0_17, %c0_18], %25 {strides = array<i32>} : memref<2x16xf32, #tpu.memory_space<vmem>>, vector<2x16xf32>,
    return
  }
  func.func @transform_0(%arg0: i32) -> (i32, i32) {
    %c0_i32 = arith.constant 0 : i32
    %c0_i32_0 = arith.constant 0 : i32
    %c0_i32_1 = arith.constant 0 : i32
    return %c0_i32, %c0_i32_0 : i32, i32
  }
  func.func @transform_1(%arg0: i32) -> (i32, i32) {
    %c0_i32 = arith.constant 0 : i32
    %c0_i32_0 = arith.constant 0 : i32
    %c0_i32_1 = arith.constant 0 : i32
    return %c0_i32, %c0_i32_0 : i32, i32
  }
  func.func @transform_2(%arg0: i32) -> (i32, i32) {
    %c0_i32 = arith.constant 0 : i32
    %c0_i32_0 = arith.constant 0 : i32
    %c0_i32_1 = arith.constant 0 : i32
    return %c0_i32, %c0_i32_0 : i32, i32
  }
  func.func @transform_3(%arg0: i32) -> (i32, i32) {
    %c0_i32 = arith.constant 0 : i32
    %c0_i32_0 = arith.constant 0 : i32
    %c0_i32_1 = arith.constant 0 : i32
    return %c0_i32, %c0_i32_0 : i32, i32
  }
  func.func @transform_4(%arg0: i32) -> (i32, i32) {
    %c0_i32 = arith.constant 0 : i32
    %c0_i32_0 = arith.constant 0 : i32
    %c0_i32_1 = arith.constant 0 : i32
    return %c0_i32, %c0_i32_0 : i32, i32
  }
  func.func @transform_5(%arg0: i32) -> (i32, i32) {
    %c0_i32 = arith.constant 0 : i32
    %c0_i32_0 = arith.constant 0 : i32
    %c0_i32_1 = arith.constant 0 : i32
    return %c0_i32, %c0_i32_0 : i32, i32
  }
}

</mosaic_0001>

<bundles_post_ra>
// kernel: classifier_arm_forward.2
= control target key start
LH: loop header
LB: loop body
LE: loop exit
PB: predicated region body
PF: predicated region fallthrough
CT: control target
= control target key end

     0   :  { %8 = vsyncpa [#allocation4], 0  ;;  %s1189_s0 = inlined_call_operand.vmem [shape: bf16[2,2,512], index: 0, kind: input, shape index: {}]   ;;  %s1190_s1 = inlined_call_operand.hbm [shape: bf16[1024,256], index: 1, kind: input, shape index: {}]   ;;  %s1191_s2 = inlined_call_operand.vmem [shape: f32[1,256], index: 2, kind: input, shape index: {}]   ;;  %s1192_s3 = inlined_call_operand.vmem [shape: bf16[2,256], index: 3, kind: output, shape index: {}]  }
   0x1   :  { %10 = vsyncpa [#allocation4 + $0x1], 0  ;;  %s1019_s12 = smov 0   ;;  %s1021_s13 = smov 0  }
   0x2   :  { %s1023_s14 = smov 0   ;;  %s1025_s15 = smov 0  }
   0x3   :  { %s1027_s16 = smov 0   ;;  %s1029_s17 = smov 0  }
   0x4   :  { %s1031_s18 = smov 0   ;;  %s1033_s19 = smov 0  }
   0x5 LB: > { %s645_s20 = sadd.s32 4294967295, %s993_s19   ;;  %s25_s21 = sadd.s32 1, %s985_s17  ;;  %s993_s19 = sphi %s1033_s19, %s16_s19   ;;  %s989_s18 = sphi %s1031_s18, %s1201_s18   ;;  %s985_s17 = sphi %s1029_s17, %s1200_s17   ;;  %s981_s16 = sphi %s1027_s16, %s1199_s16   ;;  %s977_s15 = sphi %s1025_s15, %s1198_s15   ;;  %s973_s14 = sphi %s1023_s14, %s1197_s14   ;;  %s969_s13 = sphi %s1021_s13, %s1196_s13   ;;  %s965_s12 = sphi %s1019_s12, %s1195_s12  }
   0x6   : > { %p26_p0 = scmp.ge.s32.totalorder %s25_s21, 2  ;;  %s28_s22 = sadd.s32 1, %s989_s18 }
   0x7   : > { %s58_s23 = sadd.s32 1, %s973_s14  ;;  %p65_p1 = scmp.ne.s32.totalorder %s973_s14, %s969_s13 }
   0x8   : > { %s1203_s21 = smov (%p26_p0, %s25_s21), 0  ;;  %s1205_s22 = smov (!%p26_p0, %s28_s22), %s989_s18 }
   0x9   : > { %s53_s24 = ssub.s32 %s985_s17, %s1203_s21  ;;  %p66_p2 = scmp.eq.s32.totalorder %s993_s19, 0 }
   0xa   : > { %p30_p3 = scmp.ge.s32.totalorder %s1205_s22, 2  ;;  %p71_p4 = scmp.ne.s32.totalorder %s969_s13, %s965_s12 }
   0xb   : > { %p1070_p5 = por %p66_p2, %p65_p1  ;;  %p72_p6 = scmp.eq.s32.totalorder %s645_s20, 0 }
   0xc   : > { %s1207_s22 = smov (%p30_p3, %s1205_s22), 0  ;;  %p827_p8 = scmp.lt.s32.totalorder %s993_s19, 4 }
   0xd   : > { %p1076_p7 = por %p72_p6, %p71_p4  ;;  %s54_s27 = ssub.s32 %s989_s18, %s1207_s22 }
   0xe   : > { %s55_s28 = sor.u32 %s54_s27, %s53_s24  ;;  %s150_s29 = sand.u32 1, %s973_s14  }
   0xf   : > { %p56_p9 = scmp.eq.s32.totalorder %s55_s28, 0  ;;  %s649_s30 = sshll.u32 %s150_s29, 8 }
  0x10   : > { %s788_s4 = sshll.u32 %s985_s17, 7  ;;  %s154_s8 = scalar_lea.vmem [#allocation3], %s649_s30 }
  0x11   : > { %s1086_s5 = scalar_select %p56_p9, %s973_s14, %s58_s23  }
  0x12   : > { %s159_s6 = sadd.s32 %s989_s18, %s788_s4  ;;  %s164_s9 = sshll.u32 %s154_s8, 4  ;;  %s165_s9 = int_to_ptr.vmem [resolvable:$true] %s164_s9 }
  0x13   : > { %s652_s7 = sshll.u32 %s159_s6, 2  ;;  %p824_p10 = pnand %p827_p8, %p1070_p5 }
  0x14   : > { %s161_s12 = scalar_lea.hbm %s1190_s1, %s652_s7  ;;  %p653_p11 = scmp.ge.s32.totalorder %s993_s19, 1 }
  0x15   : > { %s162_s20 = sshll.u32 %s161_s12, 4  ;;  %s151_s24 = scalar_lea.sflag [#allocation4], %s150_s29  ;;  %s163_s20 = int_to_ptr.hbm [resolvable:$true] %s162_s20 }
  0x16   : > { %s995_s27 = smov 128   ;;  %s996_s23 = smov 64  }
  0x17   : > { %s997_s28 = smov 4   ;;  %p178_p12 = scmp.lt.s32.totalorder %s993_s19, 5 }
  0x18   : > { %826 = dma.hbm_to_vmem [thread:$0]  (!%p824_p10), %s163_s20, 4096, %s165_s9, %s151_s24, %s995_s27, %s996_s23, %s997_s28  }
  0x19   : > { %p179_p13 = pnand %p653_p11, %p178_p12 }
  0x1a   : > { %s184_s30 = sand.u32 (!%p179_p13), 1, %s969_s13  }
  0x1b   : > { %182 = sbr.rel (%p179_p13) target bundleno = 229 (0xe5), region = 32  ;;  %s654_s4 = sshll.u32 (!%p179_p13), %s184_s30, 8 }
  0x1c   : > { %s185_s6 = scalar_lea.sflag (!%p179_p13), [#allocation4], %s184_s30  ;;  %s1099_s7 = scalar_lea.vmem (!%p179_p13), [#allocation3], %s654_s4 }
  0x20   : > { %960 = dma.done.wait (%p1076_p7), %s185_s6, 4096  }
  0x21   : > { %962 = vsyncadd (%p1076_p7), %s185_s6, 4294963200  ;;  %p214_p0 = scmp.lt.s32.totalorder %s981_s16, 1  ;;  %p655_p1 = scmp.ne.s32.totalorder %s977_s15, 0 }
  0x23   : > { %s1209_s16 = smov (!%p214_p0, %s981_s16), 1  ;;  %223 = sbr.rel (%p655_p1) target bundleno = 42 (0x2a), region = 40 }
  0x24   : > { %s216_s8 = scalar_lea.vmem %s1191_s2, %s1209_s16  ;;  %s219_s11 = scalar_lea.vmem %s1192_s3, %s1209_s16 }
  0x28   : > { %v998_v0 = vmov 0.0  }
  0x29   : > { %224 = vst [vmem:[#allocation2] sm:$0x3] %v998_v0 }
  0x2a PF: > { %v796_v1 = vld [vmem:[%s1099_s7 + $0x38] sm:$0xff]  ;;  %v795_v5 = vld [vmem:[%s1099_s7 + $0x30] sm:$0xff]  ;;  %s656_s26 = sshll.u32 %s977_s15, 2  ;;  %v794_v9 = vld [vmem:[%s1099_s7 + $0x28] sm:$0xff]  ;;  %p785_p2 = scmp.ne.s32.totalorder %s977_s15, 1 }
  0x2b   : > { %v804_v2 = vld [vmem:[%s1099_s7 + $0x78] sm:$0xff]  ;;  %495 = vmatpush.bf16.msra.mxu0 %v796_v1  ;;  %v803_v6 = vld [vmem:[%s1099_s7 + $0x70] sm:$0xff]  ;;  %v802_v10 = vld [vmem:[%s1099_s7 + $0x68] sm:$0xff]  ;;  %s227_s24 = scalar_lea.vmem %s1189_s0, %s656_s26 }
  0x2c   : > { %v812_v3 = vld [vmem:[%s1099_s7 + $0xb8] sm:$0xff]  ;;  %508 = vmatpush.bf16.msra.mxu1 %v804_v2  ;;  %v811_v7 = vld [vmem:[%s1099_s7 + $0xb0] sm:$0xff]  ;;  %v810_v11 = vld [vmem:[%s1099_s7 + $0xa8] sm:$0xff] }
  0x2d   : > { %v820_v4 = vld [vmem:[%s1099_s7 + $0xf8] sm:$0xff]  ;;  %521 = vmatpush.bf16.msra.mxu2 %v812_v3  ;;  %v819_v8 = vld [vmem:[%s1099_s7 + $0xf0] sm:$0xff]  ;;  %v818_v12 = vld [vmem:[%s1099_s7 + $0xe8] sm:$0xff] }
  0x2e   : > { %534 = vmatpush.bf16.msra.mxu3 %v820_v4  ;;  %v793_v13 = vld [vmem:[%s1099_s7 + $0x20] sm:$0xff]  ;;  %v228_v15 = vld [vmem:[%s227_s24] sm:$0xf]  ;;  %v790_v26 = vld [vmem:[%s1099_s7 + $0x8] sm:$0xff] }
  0x2f   : > { %496 = vmatpush.bf16.msra.mxu0 %v795_v5  ;;  %v801_v14 = vld [vmem:[%s1099_s7 + $0x60] sm:$0xff]  ;;  %294 = vst [vmem:[#allocation1] ss:$9 sm:$0xff] %v228_v15  ;;  %v792_v18 = vld [vmem:[%s1099_s7 + $0x18] sm:$0xff]  ;;  %v791_v22 = vld [vmem:[%s1099_s7 + $0x10] sm:$0xff] }
  0x30   : > { %509 = vmatpush.bf16.msra.mxu1 %v803_v6  ;;  %v809_v16 = vld [vmem:[%s1099_s7 + $0xa0] sm:$0xff]  ;;  %v800_v19 = vld [vmem:[%s1099_s7 + $0x58] sm:$0xff]  ;;  %v799_v23 = vld [vmem:[%s1099_s7 + $0x50] sm:$0xff] }
  0x31   : > { %522 = vmatpush.bf16.msra.mxu2 %v811_v7  ;;  %v817_v17 = vld [vmem:[%s1099_s7 + $0xe0] sm:$0xff]  ;;  %v808_v20 = vld [vmem:[%s1099_s7 + $0x98] sm:$0xff]  ;;  %v807_v24 = vld [vmem:[%s1099_s7 + $0x90] sm:$0xff] }
  0x32   : > { %535 = vmatpush.bf16.msra.mxu3 %v819_v8  ;;  %v816_v21 = vld [vmem:[%s1099_s7 + $0xd8] sm:$0xff]  ;;  %v815_v25 = vld [vmem:[%s1099_s7 + $0xd0] sm:$0xff]  ;;  %v798_v27 = vld [vmem:[%s1099_s7 + $0x48] sm:$0xff] }
  0x33   : > { %497 = vmatpush.bf16.msra.mxu0 %v794_v9  ;;  %v806_v28 = vld [vmem:[%s1099_s7 + $0x88] sm:$0xff]  ;;  %v789_v30 = vld [vmem:[%s1099_s7] sm:$0xff]  ;;  %v225_v46 = vld [vmem:[#allocation2] sm:$0x3] }
  0x34   : > { %510 = vmatpush.bf16.msra.mxu1 %v802_v10  ;;  %v814_v29 = vld [vmem:[%s1099_s7 + $0xc8] sm:$0xff]  ;;  %v797_v31 = vld [vmem:[%s1099_s7 + $0x40] sm:$0xff] }
  0x35   : > { %523 = vmatpush.bf16.msra.mxu2 %v810_v11  ;;  %v805_v32 = vld [vmem:[%s1099_s7 + $0x80] sm:$0xff] }
  0x36   : > { %536 = vmatpush.bf16.msra.mxu3 %v818_v12  ;;  %v813_v33 = vld [vmem:[%s1099_s7 + $0xc0] sm:$0xff]  ;;  %v295_v34 = vld [vmem:[#allocation1] sm:$0xff]  ;;  %v297_v36 = vld [vmem:[#allocation1 + $0x12] sm:$0xff] }
  0x37   : > { %498 = vmatpush.bf16.msra.mxu0 %v793_v13  ;;  %v296_v35 = vld [vmem:[#allocation1 + $0x9] sm:$0xff]  ;;  %v298_v37 = vld [vmem:[#allocation1 + $0x1b] sm:$0xff] }
  0x38   : > { %511 = vmatpush.bf16.msra.mxu1 %v801_v14 }
  0x39   : > { %524 = vmatpush.bf16.msra.mxu2 %v809_v16 }
  0x3a   : > { %537 = vmatpush.bf16.msra.mxu3 %v817_v17 }
  0x3b   : > { %499 = vmatpush.bf16.msra.mxu0 %v792_v18 }
  0x3c   : > { %512 = vmatpush.bf16.msra.mxu1 %v800_v19 }
  0x3d   : > { %525 = vmatpush.bf16.msra.mxu2 %v808_v20 }
  0x3e   : > { %538 = vmatpush.bf16.msra.mxu3 %v816_v21 }
  0x3f   : > { %500 = vmatpush.bf16.msra.mxu0 %v791_v22 }
  0x40   : > { %513 = vmatpush.bf16.msra.mxu1 %v799_v23 }
  0x41   : > { %526 = vmatpush.bf16.msra.mxu2 %v807_v24 }
  0x42   : > { %539 = vmatpush.bf16.msra.mxu3 %v815_v25 }
  0x43   : > { %501 = vmatpush.bf16.msra.mxu0 %v790_v26 }
  0x44   : > { %514 = vmatpush.bf16.msra.mxu1 %v798_v27 }
  0x45   : > { %527 = vmatpush.bf16.msra.mxu2 %v806_v28 }
  0x46   : > { %540 = vmatpush.bf16.msra.mxu3 %v814_v29 }
  0x47   : > { %502 = vmatpush.bf16.msra.mxu0 %v789_v30 }
  0x48   : > { %515 = vmatpush.bf16.msra.mxu1 %v797_v31 }
  0x49   : > { %528 = vmatpush.bf16.msra.mxu2 %v805_v32 }
  0x4a   : > { %541 = vmatpush.bf16.msra.mxu3 %v813_v33  ;;  %503 = vmatmul.bf16.vlgmr.msra.gmra.mxu0 %v295_v34 }
  0x4b   : > { %516 = vmatmul.bf16.vlgmr.msra.gmra.mxu1 %v296_v35 }
  0x4c   : > { %529 = vmatmul.bf16.vlgmr.msra.gmra.mxu2 %v297_v36 }
  0x4d   : > { %542 = vmatmul.bf16.vlgmr.msra.gmra.mxu3 %v298_v37 }
  0xc7   : > { %v504_v38 = vpop.f32.mrf.mxu0 }
  0xc8   : > { %v517_v39 = vpop.f32.mrf.mxu1 }
  0xc9   : > { %v518_v40 = vadd.f32 %v517_v39, %v504_v38 }
  0xcf   : > { %v530_v41 = vpop.f32.mrf.mxu2  ;;  %v506_v44 = vpop.f32.mrf.mxu0 }
  0xd0   : > { %v543_v42 = vpop.f32.mrf.mxu3  ;;  %v531_v43 = vadd.f32 %v530_v41, %v518_v40  ;;  %v519_v45 = vpop.f32.mrf.mxu1 }
  0xd2   : > { %v544_v47 = vadd.f32 %v543_v42, %v531_v43 }
  0xd4   : > { %v547_v48 = vadd.f32 %v544_v47, %v225_v46  ;;  %552 = sbr.rel (%p785_p2) target bundleno = 229 (0xe5), region = 44 }
  0xd6   : > { %548 = vst [vmem:[#allocation2] sm:$0x3] %v547_v48 }
  0xd7   : > { %v532_v49 = vpop.f32.mrf.mxu2 }
  0xd8   : > { %v545_v50 = vpop.f32.mrf.mxu3 }
  0xd9   : > { %v896_v52 = vld [vmem:[%s216_s8] ss:$0 sm:$0xff] }
  0xdd   : > { %v553_v51 = vld [vmem:[#allocation2] sm:$0x3] }
  0xde   : > { %v558_v53 = vadd.f32 %v896_v52, %v553_v51 }
  0xe0   : > { %v559_v54 = vmax.f32 %v558_v53, 0.0 }
  0xe2   : > { %v560_v55 = vpack.c.bf16 %v559_v54, %v559_v54 }
  0xe4   : > { %561 = vst [vmem:[%s219_s11] sm:$0x1] %v560_v55 }
  0xe5 PF: > { %s16_s19 = sadd.s32 1, %s993_s19   ;;  %s1195_s12 = smov %s969_s13 }
  0xe6   : > { %p13_p3 = scmp.ge.s32.totalorder %s16_s19, 6   ;;  %s1196_s13 = smov %s973_s14 }
  0xe7   : > { %s1197_s14 = smov %s1086_s5  ;;  %s1198_s15 = smov %s985_s17 }
  0xe8   : > { %s1199_s16 = smov %s989_s18  ;;  %s1200_s17 = smov %s1203_s21 }
  0xe9   : > { %s1201_s18 = smov %s1207_s22  ;;  %15 = sbr.rel (!%p13_p3) target bundleno = 5 (0x5), region = 84 }
  0xee   :  { %579 = vsyncpa [#allocation4], 1 }
  0xef   :  { %581 = vsyncpa [#allocation4 + $0x1], 1 }

// kernel: classifier_arm_forward.3
= control target key start
LH: loop header
LB: loop body
LE: loop exit
PB: predicated region body
PF: predicated region fallthrough
CT: control target
= control target key end

     0   :  { %s572_s0 = inlined_call_operand.vmem [shape: bf16[2,256], index: 0, kind: input, shape index: {}]   ;;  %s573_s1 = inlined_call_operand.vmem [shape: bf16[256,128], index: 1, kind: input, shape index: {}]   ;;  %s574_s2 = inlined_call_operand.vmem [shape: f32[1,128], index: 2, kind: input, shape index: {}]   ;;  %s575_s3 = inlined_call_operand.vmem [shape: bf16[128,16], index: 3, kind: input, shape index: {}]   ;;  %s576_s4 = inlined_call_operand.vmem [shape: f32[1,16], index: 4, kind: input, shape index: {}]   ;;  %s577_s5 = inlined_call_operand.hbm [shape: f32[2,16], index: 5, kind: output, shape index: {}]  }
   0x1   :  { %v404_v0 = vld [vmem:[%s573_s1 + $0x38] sm:$0xff]  ;;  %v403_v2 = vld [vmem:[%s573_s1 + $0x30] sm:$0xff]  ;;  %v21_v4 = vld [vmem:[%s572_s0] sm:$0x3] }
   0x2   :  { %v412_v1 = vld [vmem:[%s573_s1 + $0x78] sm:$0xff]  ;;  %160 = vmatpush.bf16.msra.mxu0 %v404_v0  ;;  %v411_v3 = vld [vmem:[%s573_s1 + $0x70] sm:$0xff]  ;;  %v402_v6 = vld [vmem:[%s573_s1 + $0x28] sm:$0xff]  ;;  %59 = vst [vmem:[#allocation1] ss:$9 sm:$0xff] %v21_v4 }
   0x3   :  { %173 = vmatpush.bf16.msra.mxu1 %v412_v1  ;;  %v420_v5 = vld [vmem:[%s575_s3 + $0x38] sm:$0xff]  ;;  %v410_v7 = vld [vmem:[%s573_s1 + $0x68] sm:$0xff]  ;;  %v419_v8 = vld [vmem:[%s575_s3 + $0x30] sm:$0xff] }
   0x4   :  { %258 = vmatpush.bf16.msra.mxu2 %v420_v5 }
   0x6   :  { %161 = vmatpush.bf16.msra.mxu0 %v403_v2 }
   0x7   :  { %174 = vmatpush.bf16.msra.mxu1 %v411_v3 }
   0x8   :  { %10 = vsyncpa [#allocation4], 0  ;;  %v401_v9 = vld [vmem:[%s573_s1 + $0x20] sm:$0xff]  ;;  %259 = vmatpush.bf16.msra.mxu2 %v419_v8  ;;  %v418_v11 = vld [vmem:[%s575_s3 + $0x28] sm:$0xff]  ;;  %vm271_vm0 = vcmask 123904   ;;  %s292_s20 = sshll.u32 %s577_s5, 4  ;;  %s293_s20 = int_to_ptr.hbm [resolvable:$true] %s292_s20 }
   0x9   :  { %v409_v10 = vld [vmem:[%s573_s1 + $0x60] sm:$0xff]  ;;  %v400_v12 = vld [vmem:[%s573_s1 + $0x18] sm:$0xff]  ;;  %v399_v15 = vld [vmem:[%s573_s1 + $0x10] sm:$0xff] }
   0xa   :  { %162 = vmatpush.bf16.msra.mxu0 %v402_v6  ;;  %v408_v13 = vld [vmem:[%s573_s1 + $0x58] sm:$0xff]  ;;  %v417_v14 = vld [vmem:[%s575_s3 + $0x20] sm:$0xff]  ;;  %v407_v16 = vld [vmem:[%s573_s1 + $0x50] sm:$0xff] }
   0xb   :  { %175 = vmatpush.bf16.msra.mxu1 %v410_v7  ;;  %v398_v17 = vld [vmem:[%s573_s1 + $0x8] sm:$0xff]  ;;  %v397_v19 = vld [vmem:[%s573_s1] sm:$0xff]  ;;  %v416_v23 = vld [vmem:[%s575_s3 + $0x18] sm:$0xff] }
   0xc   :  { %260 = vmatpush.bf16.msra.mxu2 %v418_v11  ;;  %v406_v18 = vld [vmem:[%s573_s1 + $0x48] sm:$0xff]  ;;  %v405_v20 = vld [vmem:[%s573_s1 + $0x40] sm:$0xff]  ;;  %v415_v24 = vld [vmem:[%s575_s3 + $0x10] sm:$0xff] }
   0xd   :  { %v60_v21 = vld [vmem:[#allocation1] sm:$0xff]  ;;  %v61_v22 = vld [vmem:[#allocation1 + $0x9] sm:$0xff] }
   0xe   :  { %163 = vmatpush.bf16.msra.mxu0 %v401_v9  ;;  %v414_v25 = vld [vmem:[%s575_s3 + $0x8] sm:$0xff]  ;;  %v413_v26 = vld [vmem:[%s575_s3] sm:$0xff] }
   0xf   :  { %176 = vmatpush.bf16.msra.mxu1 %v409_v10  ;;  %v422_v27 = vld [vmem:[%s574_s2] ss:$0 sm:$0xff]  ;;  %s454_s2 = smov [#allocation3]  }
  0x10   :  { %261 = vmatpush.bf16.msra.mxu2 %v417_v14  ;;  %v423_v37 = vld [vmem:[%s576_s4] ss:$0 sm:$0xff]  ;;  %s290_s3 = sshll.u32 %s454_s2, 4  ;;  %s291_s3 = int_to_ptr.vmem [resolvable:$true] %s290_s3 }
  0x12   :  { %164 = vmatpush.bf16.msra.mxu0 %v400_v12 }
  0x13   :  { %177 = vmatpush.bf16.msra.mxu1 %v408_v13 }
  0x14   :  { %262 = vmatpush.bf16.msra.mxu2 %v416_v23 }
  0x16   :  { %165 = vmatpush.bf16.msra.mxu0 %v399_v15 }
  0x17   :  { %178 = vmatpush.bf16.msra.mxu1 %v407_v16 }
  0x18   :  { %263 = vmatpush.bf16.msra.mxu2 %v415_v24 }
  0x1a   :  { %166 = vmatpush.bf16.msra.mxu0 %v398_v17 }
  0x1b   :  { %179 = vmatpush.bf16.msra.mxu1 %v406_v18 }
  0x1c   :  { %264 = vmatpush.bf16.msra.mxu2 %v414_v25 }
  0x1e   :  { %167 = vmatpush.bf16.msra.mxu0 %v397_v19 }
  0x1f   :  { %180 = vmatpush.bf16.msra.mxu1 %v405_v20 }
  0x20   :  { %265 = vmatpush.bf16.msra.mxu2 %v413_v26 }
  0x21   :  { %168 = vmatmul.bf16.vlgmr.msra.gmra.mxu0 %v60_v21 }
  0x22   :  { %181 = vmatmul.bf16.vlgmr.msra.gmra.mxu1 %v61_v22 }
  0x9e   :  { %v169_v28 = vpop.f32.mrf.mxu0 }
  0x9f   :  { %v182_v29 = vpop.f32.mrf.mxu1  ;;  %v170_v30 = vadd.f32 %v422_v27, %v169_v28 }
  0xa1   :  { %v183_v31 = vadd.f32 %v182_v29, %v170_v30 }
  0xa3   :  { %v186_v32 = vmax.f32 %v183_v31, 0.0 }
  0xa5   :  { %v187_v33 = vpack.c.bf16 %v186_v32, %v186_v32 }
  0xa6   :  { %v171_v34 = vpop.f32.mrf.mxu0 }
  0xa7   :  { %v184_v35 = vpop.f32.mrf.mxu1  ;;  %188 = vst [vmem:[#allocation2] sm:$0x1] %v187_v33 }
  0xae   :  { %v189_v36 = vld [vmem:[#allocation2] sm:$0x1] }
  0xaf   :  { %266 = vmatmul.bf16.vlgmr.msra.gmra.mxu2 %v189_v36 }
 0x132   :  { %v267_v38 = vpop.f32.mrf.mxu2 }
 0x133   :  { %v268_v39 = vadd.f32 %v423_v37, %v267_v38 }
 0x135   :  { %v272_v40 = vsel %vm271_vm0, %v268_v39, -inf }
 0x136   :  { %273 = vmax.xlane.f32.xlu0 %v272_v40 }
 0x13a   :  { %v269_v41 = vpop.f32.mrf.mxu2 }
 0x1a9   :  { %v274_v42 = vpop.xlane.xlu0 %273 }
 0x1aa   :  { %v275_v43 = vsub.f32 %v268_v39, %v274_v42 }
 0x1ac   :  { %v276_v44 = vmul.f32 1.442695, %v275_v43 }
 0x1ae   :  { %424 = vpow2.f32 %v276_v44 }
 0x1b4   :  { %v425_v45 = vpop.eup %424 }
 0x1b5   :  { %v278_v46 = vsel %vm271_vm0, %v425_v45, 0.0 }
 0x1b6   :  { %279 = vadd.xlane.f32.xlu0 %v278_v46 }
 0x229   :  { %v280_v47 = vpop.xlane.xlu0 %279 }
 0x22a   :  { %426 = vlog2.f32 %v280_v47 }
 0x230   :  { %v427_v48 = vpop.eup %426 }
 0x231   :  { %v282_v49 = vmul.f32 0.6931472, %v427_v48 }
 0x233   :  { %v283_v50 = vsub.f32 %v275_v43, %v282_v49 }
 0x235   :  { %284 = vst.msk [vmem:[#allocation3] sm:$0x3] %vm271_vm0, %v283_v50 }
 0x236   :  { %295 = dma.vmem_to_hbm [thread:$0]  %s291_s3, 32, %s293_s20, [#allocation4]  }
 0x237   :  { %452 = dma.done.wait [#allocation4], 32  }
 0x238   :  { %453 = vsyncadd [#allocation4], 4294967264 }
 0x239   :  { %300 = vsyncpa [#allocation4], 1 }

</bundles_post_ra>
